<compile_context>
chip_gen: v7x
topology: tpu7x:2x2x1
jax: 0.10.0
libtpu: 0.0.40
codegen_flags: <defaults>
</compile_context>

<pallas_src>
import jax
import jax.numpy as jnp
from jax.experimental import pallas as pl
from jax.experimental.pallas import tpu as pltpu


def _mlp_kernel(x_ref, w1_ref, b1_ref, w2_ref, b2_ref, w3_ref, b3_ref, o_ref):
    # Activations stay f32; only MXU operands are bf16 with f32 accumulation.
    x = x_ref[...]                                                    # (tb, E) f32

    # fc1 + ReLU  (dropout1 is identity at inference)
    h1 = jnp.dot(x.astype(jnp.bfloat16), w1_ref[...],
                 preferred_element_type=jnp.float32) + b1_ref[...]
    h1 = jnp.maximum(h1, 0.0)

    # fc2 + ReLU  (dropout2 is identity at inference)
    h2 = jnp.dot(h1.astype(jnp.bfloat16), w2_ref[...],
                 preferred_element_type=jnp.float32) + b2_ref[...]
    h2 = jnp.maximum(h2, 0.0)

    # fc3
    logits = jnp.dot(h2.astype(jnp.bfloat16), w3_ref[...],
                     preferred_element_type=jnp.float32) + b3_ref[...]

    # log_softmax over output_dim (dim=1 in PyTorch for the 2-D input)
    m = jnp.max(logits, axis=-1, keepdims=True)
    shifted = logits - m
    lse = jnp.log(jnp.sum(jnp.exp(shifted), axis=-1, keepdims=True))
    o_ref[...] = (shifted - lse).astype(o_ref.dtype)


def _round_up(n, m):
    return ((n + m - 1) // m) * m


def distribution_predictor(x, params, *, block_b=None):
    """x: (B, embedding_dim) float32. Returns (B, output_dim) f32 log-probs."""
    w1, b1, w2, b2, w3, b3 = params
    B, E = x.shape
    H = w1.shape[1]
    O = w3.shape[1]

    # Batch tile: big enough to fill the MXU M dim and amortize the ~0.35us
    # per-step grid overhead, small enough that the f32 intermediates stay
    # cheap and large batches get a multi-step (megacore-shardable) grid.
    if block_b is None:
        block_b = min(512, _round_up(B, 8))
    block_b = max(8, _round_up(block_b, 8))

    # Pad non-divisible batches; padded rows are sliced off below.
    B_pad = _round_up(B, block_b)
    if B_pad != B:
        x = jnp.pad(x, ((0, B_pad - B), (0, 0)))
    grid = (B_pad // block_b,)

    # bf16 matmul operands (weights); biases stay f32.
    w1b = w1.astype(jnp.bfloat16)
    w2b = w2.astype(jnp.bfloat16)
    w3b = w3.astype(jnp.bfloat16)

    # Explicit VMEM budget: double-buffered x/out tiles + resident weights +
    # f32 intermediates, with 4x headroom for compiler temps; capped at
    # 32 MiB so it also fits v7x (64 MiB physical VMEM).
    est = (2 * (block_b * E + block_b * O) * 4                       # x / out tiles
           + 2 * ((E * H + H * H + H * O) * 2 + (2 * H + O) * 4)     # weights + biases
           + 3 * block_b * H * 4)                                    # h1, h2, logits
    vmem_limit = min(max(4 * est, 8 * 1024 * 1024), 32 * 1024 * 1024)

    out = pl.pallas_call(
        _mlp_kernel,
        out_shape=jax.ShapeDtypeStruct((B_pad, O), jnp.float32),
        grid_spec=pltpu.PrefetchScalarGridSpec(
            num_scalar_prefetch=0,
            grid=grid,
            in_specs=[
                pl.BlockSpec((block_b, E), lambda i: (i, 0)),   # x tile (pipelined)
                pl.BlockSpec((E, H), lambda i: (0, 0)),         # w1 (resident)
                pl.BlockSpec((1, H), lambda i: (0, 0)),         # b1
                pl.BlockSpec((H, H), lambda i: (0, 0)),         # w2
                pl.BlockSpec((1, H), lambda i: (0, 0)),         # b2
                pl.BlockSpec((H, O), lambda i: (0, 0)),         # w3
                pl.BlockSpec((1, O), lambda i: (0, 0)),         # b3
            ],
            out_specs=pl.BlockSpec((block_b, O), lambda i: (i, 0)),
        ),
        compiler_params=pltpu.CompilerParams(
            dimension_semantics=("parallel",),   # megacore-shardable
            vmem_limit_bytes=vmem_limit,
        ),
    )(x, w1b, b1, w2b, b2, w3b, b3)

    return out[:B] if B_pad != B else out


def _reference(x, params):
    """Pure-JAX reference with the same bf16-operand / f32-accumulate math."""
    w1, b1, w2, b2, w3, b3 = params
    h1 = jnp.maximum(jnp.dot(x.astype(jnp.bfloat16), w1.astype(jnp.bfloat16),
                             preferred_element_type=jnp.float32) + b1, 0.0)
    h2 = jnp.maximum(jnp.dot(h1.astype(jnp.bfloat16), w2.astype(jnp.bfloat16),
                             preferred_element_type=jnp.float32) + b2, 0.0)
    logits = jnp.dot(h2.astype(jnp.bfloat16), w3.astype(jnp.bfloat16),
                     preferred_element_type=jnp.float32) + b3
    return jax.nn.log_softmax(logits, axis=-1)


def init_params(key, embedding_dim, hidden_dim, output_dim):
    ks = jax.random.split(key, 6)

    def lin(kw, kb, fan_in, fan_out):
        # deterministic uniform init similar to nn.Linear default
        bound = 1.0 / jnp.sqrt(fan_in)
        w = jax.random.uniform(kw, (fan_in, fan_out), jnp.float32, -bound, bound)
        b = jax.random.uniform(kb, (1, fan_out), jnp.float32, -bound, bound)
        return w, b

    w1, b1 = lin(ks[0], ks[1], embedding_dim, hidden_dim)
    w2, b2 = lin(ks[2], ks[3], hidden_dim, hidden_dim)
    w3, b3 = lin(ks[4], ks[5], hidden_dim, output_dim)
    return (w1, b1, w2, b2, w3, b3)


if __name__ == "__main__":
    embedding_dim = 32
    hidden_dim = 256
    output_dim = 16
    batch = 8

    key = jax.random.PRNGKey(0)
    kx, kp, kx2 = jax.random.split(key, 3)
    x = jax.random.normal(kx, (batch, embedding_dim), jnp.float32)
    params = init_params(kp, embedding_dim, hidden_dim, output_dim)

    out = jax.block_until_ready(distribution_predictor(x, params))

    # sanity: shape, rows logsumexp to ~0, and match the pure-JAX reference
    assert out.shape == (batch, output_dim)
    row_logsumexp = jax.scipy.special.logsumexp(out, axis=-1)
    assert jnp.allclose(row_logsumexp, 0.0, atol=1e-4)
    ref = _reference(x, params)
    assert jnp.allclose(out, ref, atol=1e-3, rtol=1e-3)

    # exercise the tiled + padded (non-divisible batch) path
    x2 = jax.random.normal(kx2, (20, embedding_dim), jnp.float32)
    out2 = jax.block_until_ready(distribution_predictor(x2, params, block_b=16))
    assert out2.shape == (20, output_dim)
    assert jnp.allclose(out2, _reference(x2, params), atol=1e-3, rtol=1e-3)

    print("KERNEL_OK")
</pallas_src>

<mosaic_0001>
module attributes {stable_mosaic.version = 11 : i64} {
  func.func @_mlp_kernel(%arg0: i32, %arg1: memref<8x32xf32, #tpu.memory_space<vmem>>, %arg2: memref<32x256xbf16, #tpu.memory_space<vmem>>, %arg3: memref<1x256xf32, #tpu.memory_space<vmem>>, %arg4: memref<256x256xbf16, #tpu.memory_space<vmem>>, %arg5: memref<1x256xf32, #tpu.memory_space<vmem>>, %arg6: memref<256x16xbf16, #tpu.memory_space<vmem>>, %arg7: memref<1x16xf32, #tpu.memory_space<vmem>>, %arg8: memref<8x16xf32, #tpu.memory_space<vmem>>) attributes {dimension_semantics = [#tpu.dimension_semantics<parallel>], iteration_bounds = array<i64: 1>, scalar_prefetch = 0 : i64, scratch_operands = 0 : i64, tpu.core_type = #tpu.core_type<tc>, window_params = [{transform_indices = @transform_0, window_bounds = array<i64: 8, 32>}, {pipeline_mode = #tpu.pipeline_mode<synchronous>, transform_indices = @transform_1, window_bounds = array<i64: 32, 256>}, {pipeline_mode = #tpu.pipeline_mode<synchronous>, transform_indices = @transform_2, window_bounds = array<i64: 1, 256>}, {pipeline_mode = #tpu.pipeline_mode<synchronous>, transform_indices = @transform_3, window_bounds = array<i64: 256, 256>}, {pipeline_mode = #tpu.pipeline_mode<synchronous>, transform_indices = @transform_4, window_bounds = array<i64: 1, 256>}, {pipeline_mode = #tpu.pipeline_mode<synchronous>, transform_indices = @transform_5, window_bounds = array<i64: 256, 16>}, {pipeline_mode = #tpu.pipeline_mode<synchronous>, transform_indices = @transform_6, window_bounds = array<i64: 1, 16>}, {transform_indices = @transform_7, window_bounds = array<i64: 8, 16>}]} {
    %c0 = arith.constant 0 : index
    %c0_0 = arith.constant 0 : index
    %0 = vector.load %arg1[%c0, %c0_0] : memref<8x32xf32, #tpu.memory_space<vmem>>, vector<8x32xf32>
    %1 = arith.truncf %0 : vector<8x32xf32> to vector<8x32xbf16>
    %c0_1 = arith.constant 0 : index
    %c0_2 = arith.constant 0 : index
    %2 = vector.load %arg2[%c0_1, %c0_2] : memref<32x256xbf16, #tpu.memory_space<vmem>>, vector<32x256xbf16>
    %cst = arith.constant dense<0.000000e+00> : vector<8x256xf32>
    %3 = tpu.matmul %1, %2, %cst {dimension_numbers = #tpu.dot_dimension_numbers<[1], [0], [0], [1], [0, 0, 1, 1], [], []>} : vector<8x32xbf16>, vector<32x256xbf16>, vector<8x256xf32> -> vector<8x256xf32>
    %c0_3 = arith.constant 0 : index
    %c0_4 = arith.constant 0 : index
    %4 = vector.load %arg3[%c0_3, %c0_4] : memref<1x256xf32, #tpu.memory_space<vmem>>, vector<1x256xf32>
    %5 = vector.broadcast %4 : vector<1x256xf32> to vector<8x256xf32>
    %6 = arith.addf %3, %5 : vector<8x256xf32>
    %cst_5 = arith.constant 0.000000e+00 : f32
    %7 = vector.broadcast %cst_5 : f32 to vector<8x256xf32>
    %8 = arith.maximumf %6, %7 : vector<8x256xf32>
    %9 = arith.truncf %8 : vector<8x256xf32> to vector<8x256xbf16>
    %c0_6 = arith.constant 0 : index
    %c0_7 = arith.constant 0 : index
    %10 = vector.load %arg4[%c0_6, %c0_7] : memref<256x256xbf16, #tpu.memory_space<vmem>>, vector<256x256xbf16>
    %cst_8 = arith.constant dense<0.000000e+00> : vector<8x256xf32>
    %11 = tpu.matmul %9, %10, %cst_8 {dimension_numbers = #tpu.dot_dimension_numbers<[1], [0], [0], [1], [0, 0, 1, 1], [], []>} : vector<8x256xbf16>, vector<256x256xbf16>, vector<8x256xf32> -> vector<8x256xf32>
    %c0_9 = arith.constant 0 : index
    %c0_10 = arith.constant 0 : index
    %12 = vector.load %arg5[%c0_9, %c0_10] : memref<1x256xf32, #tpu.memory_space<vmem>>, vector<1x256xf32>
    %13 = vector.broadcast %12 : vector<1x256xf32> to vector<8x256xf32>
    %14 = arith.addf %11, %13 : vector<8x256xf32>
    %cst_11 = arith.constant 0.000000e+00 : f32
    %15 = vector.broadcast %cst_11 : f32 to vector<8x256xf32>
    %16 = arith.maximumf %14, %15 : vector<8x256xf32>
    %17 = arith.truncf %16 : vector<8x256xf32> to vector<8x256xbf16>
    %c0_12 = arith.constant 0 : index
    %c0_13 = arith.constant 0 : index
    %18 = vector.load %arg6[%c0_12, %c0_13] : memref<256x16xbf16, #tpu.memory_space<vmem>>, vector<256x16xbf16>
    %cst_14 = arith.constant dense<0.000000e+00> : vector<8x16xf32>
    %19 = tpu.matmul %17, %18, %cst_14 {dimension_numbers = #tpu.dot_dimension_numbers<[1], [0], [0], [1], [0, 0, 1, 1], [], []>} : vector<8x256xbf16>, vector<256x16xbf16>, vector<8x16xf32> -> vector<8x16xf32>
    %c0_15 = arith.constant 0 : index
    %c0_16 = arith.constant 0 : index
    %20 = vector.load %arg7[%c0_15, %c0_16] : memref<1x16xf32, #tpu.memory_space<vmem>>, vector<1x16xf32>
    %21 = vector.broadcast %20 : vector<1x16xf32> to vector<8x16xf32>
    %22 = arith.addf %19, %21 : vector<8x16xf32>
    %cst_17 = arith.constant dense<0xFF800000> : vector<8xf32>
    %23 = vector.multi_reduction <maximumf>, %22, %cst_17 [1] : vector<8x16xf32> to vector<8xf32>
    %24 = vector.shape_cast %23 : vector<8xf32> to vector<8x1xf32>
    %25 = vector.broadcast %24 : vector<8x1xf32> to vector<8x16xf32>
    %26 = arith.subf %22, %25 : vector<8x16xf32>
    %27 = math.exp %26 : vector<8x16xf32>
    %cst_18 = arith.constant dense<0.000000e+00> : vector<8xf32>
    %28 = vector.multi_reduction <add>, %27, %cst_18 [1] : vector<8x16xf32> to vector<8xf32>
    %29 = vector.shape_cast %28 : vector<8xf32> to vector<8x1xf32>
    %30 = math.log %29 : vector<8x1xf32>
    %31 = vector.broadcast %30 : vector<8x1xf32> to vector<8x16xf32>
    %32 = arith.subf %26, %31 : vector<8x16xf32>
    %c0_19 = arith.constant 0 : index
    %c0_20 = arith.constant 0 : index
    %33 = vector.load %arg8[%c0_19, %c0_20] : memref<8x16xf32, #tpu.memory_space<vmem>>, vector<8x16xf32>
    tpu.vector_store %arg8[%c0_19, %c0_20], %32 {strides = array<i32>} : memref<8x16xf32, #tpu.memory_space<vmem>>, vector<8x16xf32>,
    return
  }
  func.func @transform_0(%arg0: i32) -> (i32, i32) {
    %c0_i32 = arith.constant 0 : i32
    %c0_i32_0 = arith.constant 0 : i32
    return %arg0, %c0_i32 : i32, i32
  }
  func.func @transform_1(%arg0: i32) -> (i32, i32) {
    %c0_i32 = arith.constant 0 : i32
    %c0_i32_0 = arith.constant 0 : i32
    %c0_i32_1 = arith.constant 0 : i32
    return %c0_i32, %c0_i32_0 : i32, i32
  }
  func.func @transform_2(%arg0: i32) -> (i32, i32) {
    %c0_i32 = arith.constant 0 : i32
    %c0_i32_0 = arith.constant 0 : i32
    %c0_i32_1 = arith.constant 0 : i32
    return %c0_i32, %c0_i32_0 : i32, i32
  }
  func.func @transform_3(%arg0: i32) -> (i32, i32) {
    %c0_i32 = arith.constant 0 : i32
    %c0_i32_0 = arith.constant 0 : i32
    %c0_i32_1 = arith.constant 0 : i32
    return %c0_i32, %c0_i32_0 : i32, i32
  }
  func.func @transform_4(%arg0: i32) -> (i32, i32) {
    %c0_i32 = arith.constant 0 : i32
    %c0_i32_0 = arith.constant 0 : i32
    %c0_i32_1 = arith.constant 0 : i32
    return %c0_i32, %c0_i32_0 : i32, i32
  }
  func.func @transform_5(%arg0: i32) -> (i32, i32) {
    %c0_i32 = arith.constant 0 : i32
    %c0_i32_0 = arith.constant 0 : i32
    %c0_i32_1 = arith.constant 0 : i32
    return %c0_i32, %c0_i32_0 : i32, i32
  }
  func.func @transform_6(%arg0: i32) -> (i32, i32) {
    %c0_i32 = arith.constant 0 : i32
    %c0_i32_0 = arith.constant 0 : i32
    %c0_i32_1 = arith.constant 0 : i32
    return %c0_i32, %c0_i32_0 : i32, i32
  }
  func.func @transform_7(%arg0: i32) -> (i32, i32) {
    %c0_i32 = arith.constant 0 : i32
    %c0_i32_0 = arith.constant 0 : i32
    return %arg0, %c0_i32 : i32, i32
  }
}

</mosaic_0001>

<bundles_post_ra>
// kernel: tpu_custom_call.1
= control target key start
LH: loop header
LB: loop body
LE: loop exit
PB: predicated region body
PF: predicated region fallthrough
CT: control target
= control target key end

     0   :  { %12 = vsyncpa [#allocation3], 0  ;;  %s929_s0 = inlined_call_operand.vmem [shape: f32[8,32], index: 0, kind: input, shape index: {}]   ;;  %s930_s1 = inlined_call_operand.vmem [shape: bf16[32,256], index: 1, kind: input, shape index: {}]   ;;  %s931_s2 = inlined_call_operand.vmem [shape: f32[1,256], index: 2, kind: input, shape index: {}]   ;;  %s932_s3 = inlined_call_operand.hbm [shape: bf16[256,256], index: 3, kind: input, shape index: {}]   ;;  %s933_s4 = inlined_call_operand.vmem [shape: f32[1,256], index: 4, kind: input, shape index: {}]   ;;  %s934_s5 = inlined_call_operand.vmem [shape: bf16[256,16], index: 5, kind: input, shape index: {}]   ;;  %s935_s6 = inlined_call_operand.vmem [shape: f32[1,16], index: 6, kind: input, shape index: {}]   ;;  %s936_s7 = inlined_call_operand.hbm [shape: f32[8,16], index: 7, kind: output, shape index: {}]  }
   0x1   :  { %13 = vsyncpa [#allocation4], 0  ;;  %s785_s24 = smov [#allocation2]   ;;  %s737_s28 = scalar_lea.hbm %s932_s3, 4096 }
   0x2   :  { %s25_s25 = sshll.u32 %s785_s24, 4  ;;  %p738_p0 = scmp.ne.s32.totalorder %s932_s3, %s737_s28  ;;  %s26_s25 = int_to_ptr.vmem [resolvable:$true] %s25_s25 }
   0x3   :  { %p741_p1 = scmp.lt.u32.totalorder %s737_s28, %s932_s3 }
   0x5   :  { %p743_p2 = pnand %p741_p1, %p738_p0 }
   0x7   :  { %746 = shalt.err (!%p743_p2)
}
   0x8   :  { %s747_s10 = scalar_lea.vmem %s26_s25, 4096  ;;  %p752_p4 = scmp.lt.s32.totalorder %s26_s25, %s26_s25 }
   0x9   :  { %p748_p3 = scmp.ne.s32.totalorder %s26_s25, %s747_s10  ;;  %p753_p5 = scmp.lt.s32.totalorder %s747_s10, %s747_s10 }
   0xb   :  { %p754_p6 = por %p753_p5, %p752_p4 }
   0xd   :  { %p755_p7 = pnand %p754_p6, %p748_p3 }
   0xf   :  { %758 = shalt.err (!%p755_p7)
}
  0x10   :  { %s786_s11 = smov 128   ;;  %s787_s12 = smov 8  }
  0x11   :  { %31 = dma.hbm_to_vmem [thread:$0]  %s932_s3, 4096, %s26_s25, [#allocation3], %s786_s11, %s786_s11, %s787_s12  }
  0x12   :  { %781 = dma.done.wait [#allocation3], 4096  }
  0x13   :  { %782 = vsyncadd [#allocation3], 4294963200  ;;  %v788_v0 = vmov 0   ;;  %v663_v1 = vld [vmem:[%s930_s1 + $0x4] ss:$8 sps:$4 sm:$0xff]   ;;  %vm80_vm0 = vcmask 261120   ;;  %v50_v51 = vlaneseq }
  0x14   :  { %116 = vmatprep.mubr.bf16.mxu0 %v788_v0  ;;  %v665_v2 = vld [vmem:[%s930_s1] ss:$8 sps:$4 sm:$0xff]   ;;  %84 = vmatprep.subr.bf16.mxu0 %v663_v1  ;;  %v666_v3 = vld [vmem:[%s930_s1 + $0x14] ss:$8 sps:$4 sm:$0xff]   ;;  %v668_v4 = vld [vmem:[%s930_s1 + $0x10] ss:$8 sps:$4 sm:$0xff]  }
  0x15   :  { %v42_v5 = vld [vmem:[%s929_s0] sm:$0xff]  ;;  %85 = vmatpush1.bf16.msra.mxu0 %v665_v2  ;;  %v672_v8 = vld [vmem:[#allocation2 + $0x14] ss:$8 sps:$4 sm:$0xff]   ;;  %v674_v10 = vld [vmem:[#allocation2 + $0x10] ss:$8 sps:$4 sm:$0xff]   ;;  %v51_v52 = vshrl.u32 %v50_v51, 7 }
  0x16   :  { %v669_v6 = vld [vmem:[#allocation2 + $0x4] ss:$8 sps:$4 sm:$0xff]   ;;  %86 = vmatprep.subr.bf16.mxu0 %v666_v3  ;;  %v671_v7 = vld [vmem:[#allocation2] ss:$8 sps:$4 sm:$0xff]   ;;  %v43_v9 = vpack.c.bf16 %v42_v5, %v42_v5  ;;  %v678_v13 = vld [vmem:[#allocation2 + $0x34] ss:$8 sps:$4 sm:$0xff]  }
  0x17   :  { %333 = vmatprep.subr.bf16.mxu1 %v669_v6  ;;  %v675_v11 = vld [vmem:[#allocation2 + $0x24] ss:$8 sps:$4 sm:$0xff]   ;;  %v677_v12 = vld [vmem:[#allocation2 + $0x20] ss:$8 sps:$4 sm:$0xff]   ;;  %v680_v14 = vld [vmem:[#allocation2 + $0x30] ss:$8 sps:$4 sm:$0xff]  }
  0x18   :  { %334 = vmatpush1.bf16.msra.mxu1 %v671_v7  ;;  %v681_v15 = vld [vmem:[#allocation2 + $0x44] ss:$8 sps:$4 sm:$0xff]   ;;  %v683_v16 = vld [vmem:[#allocation2 + $0x40] ss:$8 sps:$4 sm:$0xff]   ;;  %v684_v17 = vld [vmem:[#allocation2 + $0x54] ss:$8 sps:$4 sm:$0xff]  }
  0x19   :  { %87 = vmatpush1.bf16.msra.mxu0 %v668_v4  ;;  %335 = vmatprep.subr.bf16.mxu1 %v672_v8  ;;  %v686_v18 = vld [vmem:[#allocation2 + $0x50] ss:$8 sps:$4 sm:$0xff]   ;;  %v687_v19 = vld [vmem:[#allocation2 + $0x64] ss:$8 sps:$4 sm:$0xff]   ;;  %v689_v20 = vld [vmem:[#allocation2 + $0x60] ss:$8 sps:$4 sm:$0xff]  }
  0x1a   :  { %v690_v21 = vld [vmem:[#allocation2 + $0x74] ss:$8 sps:$4 sm:$0xff]   ;;  %v692_v22 = vld [vmem:[#allocation2 + $0x70] ss:$8 sps:$4 sm:$0xff]   ;;  %v693_v23 = vld [vmem:[#allocation2 + $0x84] ss:$8 sps:$4 sm:$0xff]  }
  0x1b   :  { %v695_v24 = vld [vmem:[#allocation2 + $0x80] ss:$8 sps:$4 sm:$0xff]   ;;  %v696_v25 = vld [vmem:[#allocation2 + $0x94] ss:$8 sps:$4 sm:$0xff]   ;;  %v698_v26 = vld [vmem:[#allocation2 + $0x90] ss:$8 sps:$4 sm:$0xff]  }
  0x1c   :  { %586 = vmatmul.mubr.msk.bf16.vlgmr.msra.gmra.mrb[0].mxu0 %vm80_vm0, %v43_v9  ;;  %336 = vmatpush1.bf16.msra.mxu1 %v674_v10  ;;  %v699_v27 = vld [vmem:[#allocation2 + $0xa4] ss:$8 sps:$4 sm:$0xff]   ;;  %v701_v28 = vld [vmem:[#allocation2 + $0xa0] ss:$8 sps:$4 sm:$0xff]   ;;  %v702_v29 = vld [vmem:[#allocation2 + $0xb4] ss:$8 sps:$4 sm:$0xff]  }
  0x1d   :  { %337 = vmatprep.subr.bf16.mxu1 %v675_v11  ;;  %v704_v30 = vld [vmem:[#allocation2 + $0xb0] ss:$8 sps:$4 sm:$0xff]   ;;  %v705_v31 = vld [vmem:[#allocation2 + $0xc4] ss:$8 sps:$4 sm:$0xff]   ;;  %v707_v32 = vld [vmem:[#allocation2 + $0xc0] ss:$8 sps:$4 sm:$0xff]  }
  0x1e   :  { %v708_v33 = vld [vmem:[#allocation2 + $0xd4] ss:$8 sps:$4 sm:$0xff]   ;;  %v710_v34 = vld [vmem:[#allocation2 + $0xd0] ss:$8 sps:$4 sm:$0xff]   ;;  %v711_v35 = vld [vmem:[#allocation2 + $0xe4] ss:$8 sps:$4 sm:$0xff]  }
  0x1f   :  { %v713_v36 = vld [vmem:[#allocation2 + $0xe0] ss:$8 sps:$4 sm:$0xff]   ;;  %v714_v37 = vld [vmem:[#allocation2 + $0xf4] ss:$8 sps:$4 sm:$0xff]   ;;  %v716_v38 = vld [vmem:[#allocation2 + $0xf0] ss:$8 sps:$4 sm:$0xff]  }
  0x20   :  { %338 = vmatpush1.bf16.msra.mxu1 %v677_v12  ;;  %v717_v39 = vld [vmem:[%s934_s5 + $0x40] sm:$0xff]   ;;  %v719_v41 = vld [vmem:[%s934_s5 + $0x48] sm:$0xff]   ;;  %v721_v43 = vld [vmem:[%s934_s5 + $0x50] sm:$0xff]   ;;  %v52_v53 = vsub.s32 0, %v51_v52  ;;  %v56_v55 = vsub.s32 1, %v51_v52  ;;  %vm553_vm1 = vcmask 130048  }
  0x21   :  { %339 = vmatprep.subr.bf16.mxu1 %v678_v13  ;;  %v718_v40 = vld [vmem:[%s934_s5] sm:$0xff]   ;;  %636 = vmatprep.subr.bf16.mxu0 %v717_v39  ;;  %v720_v42 = vld [vmem:[%s934_s5 + $0x8] sm:$0xff]   ;;  %v722_v44 = vld [vmem:[%s934_s5 + $0x10] sm:$0xff]  }
  0x22   :  { %637 = vmatpush3.bf16.msra.mxu0 %v718_v40  ;;  %v723_v45 = vld [vmem:[%s934_s5 + $0x58] sm:$0xff]   ;;  %v725_v47 = vld [vmem:[%s934_s5 + $0x60] sm:$0xff]   ;;  %v727_v49 = vld [vmem:[%s934_s5 + $0x68] sm:$0xff]  }
  0x23   :  { %638 = vmatprep.subr.bf16.mxu0 %v719_v41  ;;  %v724_v46 = vld [vmem:[%s934_s5 + $0x18] sm:$0xff]   ;;  %v726_v48 = vld [vmem:[%s934_s5 + $0x20] sm:$0xff]   ;;  %v728_v50 = vld [vmem:[%s934_s5 + $0x28] sm:$0xff]  }
  0x24   :  { %340 = vmatpush1.bf16.msra.mxu1 %v680_v14  ;;  %v48_v54 = vld [vmem:[%s931_s2] sm:$0x3]  ;;  %v729_v4 = vld [vmem:[%s934_s5 + $0x70] sm:$0xff]   ;;  %v731_v6 = vld [vmem:[%s934_s5 + $0x78] sm:$0xff]  }
  0x25   :  { %341 = vmatprep.subr.bf16.mxu1 %v681_v15  ;;  %v53_v56 = vrot.slane %v48_v54, %v52_v53  ;;  %v57_v57 = vrot.slane %v48_v54, %v56_v55  ;;  %v730_v5 = vld [vmem:[%s934_s5 + $0x30] sm:$0xff]   ;;  %v732_v7 = vld [vmem:[%s934_s5 + $0x38] sm:$0xff]   ;;  %v161_v8 = vld [vmem:[%s933_s4] sm:$0x3]  ;;  %s789_s4 = smov [#allocation5]  }
  0x26   :  { %639 = vmatpush3.bf16.msra.mxu0 %v720_v42  ;;  %v166_v9 = vrot.slane %v161_v8, %v52_v53  ;;  %v170_v10 = vrot.slane %v161_v8, %v56_v55 }
  0x27   :  { %640 = vmatprep.subr.bf16.mxu0 %v721_v43 }
  0x28   :  { %342 = vmatpush1.bf16.msra.mxu1 %v683_v16 }
  0x29   :  { %343 = vmatprep.subr.bf16.mxu1 %v684_v17 }
  0x2a   :  { %641 = vmatpush3.bf16.msra.mxu0 %v722_v44 }
  0x2b   :  { %642 = vmatprep.subr.bf16.mxu0 %v723_v45 }
  0x2c   :  { %344 = vmatpush1.bf16.msra.mxu1 %v686_v18 }
  0x2d   :  { %345 = vmatprep.subr.bf16.mxu1 %v687_v19 }
  0x2e   :  { %643 = vmatpush3.bf16.msra.mxu0 %v724_v46 }
  0x2f   :  { %644 = vmatprep.subr.bf16.mxu0 %v725_v47 }
  0x30   :  { %346 = vmatpush1.bf16.msra.mxu1 %v689_v20 }
  0x31   :  { %347 = vmatprep.subr.bf16.mxu1 %v690_v21 }
  0x32   :  { %645 = vmatpush3.bf16.msra.mxu0 %v726_v48 }
  0x33   :  { %646 = vmatprep.subr.bf16.mxu0 %v727_v49 }
  0x34   :  { %348 = vmatpush1.bf16.msra.mxu1 %v692_v22 }
  0x35   :  { %349 = vmatprep.subr.bf16.mxu1 %v693_v23  ;;  %v619_v23 = vld [vmem:[%s935_s6] ss:$0 sm:$0xff]  ;;  %s573_s6 = sshll.u32 %s789_s4, 4  ;;  %s574_s6 = int_to_ptr.vmem [resolvable:$true] %s573_s6 }
  0x36   :  { %647 = vmatpush3.bf16.msra.mxu0 %v728_v50  ;;  %s759_s9 = scalar_lea.vmem %s574_s6, 128  ;;  %p764_p9 = scmp.lt.s32.totalorder %s574_s6, %s574_s6 }
  0x37   :  { %648 = vmatprep.subr.bf16.mxu0 %v729_v4  ;;  %p760_p8 = scmp.ne.s32.totalorder %s574_s6, %s759_s9  ;;  %p765_p10 = scmp.lt.s32.totalorder %s759_s9, %s759_s9 }
  0x38   :  { %350 = vmatpush1.bf16.msra.mxu1 %v695_v24 }
  0x39   :  { %351 = vmatprep.subr.bf16.mxu1 %v696_v25  ;;  %p766_p11 = por %p765_p10, %p764_p9 }
  0x3a   :  { %649 = vmatpush3.bf16.msra.mxu0 %v730_v5 }
  0x3b   :  { %650 = vmatprep.subr.bf16.mxu0 %v731_v6  ;;  %p767_p12 = pnand %p766_p11, %p760_p8 }
  0x3c   :  { %352 = vmatpush1.bf16.msra.mxu1 %v698_v26 }
  0x3d   :  { %353 = vmatprep.subr.bf16.mxu1 %v699_v27 }
  0x3e   :  { %651 = vmatpush3.bf16.msra.mxu0 %v732_v7 }
  0x40   :  { %354 = vmatpush1.bf16.msra.mxu1 %v701_v28 }
  0x41   :  { %355 = vmatprep.subr.bf16.mxu1 %v702_v29 }
  0x44   :  { %356 = vmatpush1.bf16.msra.mxu1 %v704_v30 }
  0x45   :  { %357 = vmatprep.subr.bf16.mxu1 %v705_v31 }
  0x48   :  { %358 = vmatpush1.bf16.msra.mxu1 %v707_v32 }
  0x49   :  { %359 = vmatprep.subr.bf16.mxu1 %v708_v33 }
  0x4c   :  { %360 = vmatpush1.bf16.msra.mxu1 %v710_v34 }
  0x4d   :  { %361 = vmatprep.subr.bf16.mxu1 %v711_v35 }
  0x50   :  { %362 = vmatpush1.bf16.msra.mxu1 %v713_v36 }
  0x51   :  { %363 = vmatprep.subr.bf16.mxu1 %v714_v37 }
  0x54   :  { %364 = vmatpush1.bf16.msra.mxu1 %v716_v38 }
  0xef   :  { %v118_v58 = vpop.f32.mrb[0].mxu0 }
  0xf0   :  { %v119_v59 = vadd.f32 %v118_v58, %v53_v56  ;;  %v120_v60 = vpop.f32.mrb[1].mxu0 }
  0xf1   :  { %v121_v61 = vadd.f32 %v120_v60, %v57_v57  ;;  %v122_v62 = vpop.f32.mrb[2].mxu0 }
  0xf2   :  { %v125_v63 = vmax.f32 %v119_v59, 0.0  ;;  %v123_v0 = vpop.f32.mrb[3].mxu0 }
  0xf3   :  { %v126_v1 = vmax.f32 %v121_v61, 0.0 }
  0xf4   :  { %v127_v3 = vpack.c.bf16 %v125_v63, %v125_v63 }
  0xf5   :  { %v128_v2 = vpack.c.bf16 %v126_v1, %v126_v1 }
  0xf7   :  { %365 = vmatprep.mubr.bf16.mxu1 %v128_v2 }
  0xf8   :  { %366 = vmatmul.mubr.bf16.vlgmr.msra.gmra.mrb[0].mxu1 %v127_v3 }
 0x1cb   :  { %v367_v11 = vpop.f32.mrb[0].mxu1 }
 0x1cc   :  { %v368_v12 = vadd.f32 %v367_v11, %v166_v9  ;;  %v369_v13 = vpop.f32.mrb[1].mxu1 }
 0x1cd   :  { %v370_v14 = vadd.f32 %v369_v13, %v170_v10  ;;  %v371_v15 = vpop.f32.mrb[2].mxu1 }
 0x1ce   :  { %v374_v16 = vmax.f32 %v368_v12, 0.0  ;;  %v372_v17 = vpop.f32.mrb[3].mxu1 }
 0x1cf   :  { %v375_v18 = vmax.f32 %v370_v14, 0.0 }
 0x1d0   :  { %v376_v20 = vpack.c.bf16 %v374_v16, %v374_v16 }
 0x1d1   :  { %v377_v19 = vpack.c.bf16 %v375_v18, %v375_v18 }
 0x1d3   :  { %545 = vmatprep.mubr.bf16.mxu0 %v377_v19 }
 0x1d4   :  { %546 = vmatmul.mubr.bf16.vlgmr.msra.gmra.mrb[4].mxu0 %v376_v20 }
 0x2a7   :  { %v652_v21 = vpop.f32.mrb[4].mxu0 }
 0x2a8   :  { %v653_v22 = vpop.f32.mrb[5].mxu0 }
 0x2a9   :  { %v654_v24 = vadd.f32 %v653_v22, %v652_v21  ;;  %v655_v25 = vpop.f32.mrb[6].mxu0 }
 0x2aa   :  { %v656_v26 = vpop.f32.mrb[7].mxu0 }
 0x2ab   :  { %v548_v27 = vadd.f32 %v654_v24, %v619_v23 }
 0x2ad   :  { %v554_v28 = vsel %vm553_vm1, %v548_v27, -inf }
 0x2ae   :  { %555 = vmax.xlane.f32.xlu0 %v554_v28 }
 0x33b   :  { %v556_v29 = vpop.xlane.xlu0 %555 }
 0x33c   :  { %v557_v30 = vsub.f32 %v548_v27, %v556_v29 }
 0x33e   :  { %v558_v31 = vmul.f32 1.442695, %v557_v30 }
 0x340   :  { %733 = vpow2.f32 %v558_v31 }
 0x34a   :  { %v734_v32 = vpop.eup %733 }
 0x34b   :  { %v560_v33 = vsel %vm553_vm1, %v734_v32, 0.0 }
 0x34c   :  { %561 = vadd.xlane.f32.xlu0 %v560_v33 }
 0x3d9   :  { %v562_v34 = vpop.xlane.xlu0 %561 }
 0x3da   :  { %735 = vlog2.f32 %v562_v34 }
 0x3e4   :  { %v736_v35 = vpop.eup %735 }
 0x3e5   :  { %v564_v36 = vmul.f32 0.6931472, %v736_v35 }
 0x3e7   :  { %v565_v37 = vsub.f32 %v557_v30, %v564_v36 }
 0x3e9   :  { %566 = vst.msk [vmem:[#allocation5] sm:$0xff] %vm553_vm1, %v565_v37 }
 0x3ea   :  { %770 = shalt.err (!%p767_p12)
}
 0x3eb   :  { %s771_s12 = scalar_lea.hbm %s936_s7, 128 }
 0x3ec   :  { %p772_p13 = scmp.ne.s32.totalorder %s936_s7, %s771_s12  ;;  %p775_p0 = scmp.lt.u32.totalorder %s771_s12, %s936_s7 }
 0x3ee   :  { %p777_p1 = pnand %p775_p0, %p772_p13 }
 0x3f0   :  { %780 = shalt.err (!%p777_p1)
}
 0x3f1   :  { %576 = dma.vmem_to_hbm [thread:$0]  %s574_s6, 128, %s936_s7, [#allocation4]  }
 0x3f2   :  { %783 = dma.done.wait [#allocation4], 128  }
 0x3f3   :  { %784 = vsyncadd [#allocation4], 4294967168 }
 0x3f4   :  { %580 = vsyncpa [#allocation3], 1 }
 0x3f5   :  { %581 = vsyncpa [#allocation4], 1 }

</bundles_post_ra>
